<compile_context>
chip_gen: v6e
topology: v6e:2x2x1
jax: 0.10.0
libtpu: 0.0.40
codegen_flags: <defaults>
</compile_context>

<pallas_src>
import math

import jax
import jax.numpy as jnp
from jax import lax
from jax.experimental import pallas as pl
from jax.experimental.pallas import tpu as pltpu


def _readout_kernel(x_ref, w_ref, b_ref, o_ref):
    # grid: (m, k); k is the reduction axis, o_ref is resident across it and is
    # used directly as the f32 accumulator (output dtype here is f32).
    k = pl.program_id(1)

    @pl.when(k == 0)
    def _():
        # Seed the resident output/accumulator with the bias row.
        o_ref[...] = jnp.broadcast_to(b_ref[...], o_ref.shape).astype(o_ref.dtype)

    # x_ref: (N, tk), w_ref: (tm, tk) -- contract the shared (lane-dense) K axis.
    o_ref[...] += lax.dot_general(
        x_ref[...],
        w_ref[...],
        dimension_numbers=(((1,), (1,)), ((), ())),
        preferred_element_type=jnp.float32,
    ).astype(o_ref.dtype)


def _choose_tm(M):
    if M <= 1024:
        return M                        # whole output dim in one lane-layout block
    for t in (1024, 512, 256, 128):     # lane-dense tiles for very large out_size
        if M % t == 0:
            return t
    return M


def _choose_tk(K, N, tm, budget_bytes=16 << 20):
    """Largest K tile that keeps the double-buffered streams under a VMEM budget
    small enough for v7x's 32 MiB scoped-VMEM default (with headroom)."""
    per_k = 2 * (N + tm) * 4            # double-buffered x-row tile + weight tile, f32
    cap = max(128, budget_bytes // per_k)
    if K <= cap:
        return K, 0                     # whole K in one tile: no reduction loop at all
    tk_max = max(128, (cap // 128) * 128)
    for t in range(tk_max, 127, -128):  # largest multiple-of-128 divisor of K
        if K % t == 0:
            return t, 0
    pad = (-K) % tk_max                 # otherwise zero-pad K (zeros add nothing to y)
    return tk_max, pad


def readout_forward(x, weight, bias):
    """y = flatten(x) @ weight.T + bias  (same semantics as ReadOut.forward).

    x:      (N, C, H, W) float32
    weight: (out_size, K) float32, K = C*H*W   (native torch nn.Linear layout)
    bias:   (out_size,)   float32
    """
    N = x.shape[0]
    K = math.prod(x.shape[1:])          # static Python int, no device round-trip
    M, Kw = weight.shape
    assert Kw == K

    x_flat = x.reshape(N, K)            # matches torch x.view(N, -1)
    b2d = bias.reshape(1, M)            # broadcast row

    tm = _choose_tm(M)
    tk, pad = _choose_tk(K, N, tm)
    if pad:
        x_flat = jnp.pad(x_flat, ((0, 0), (0, pad)))
        weight = jnp.pad(weight, ((0, 0), (0, pad)))
    n_m = M // tm
    n_k = (K + pad) // tk

    # TODO(synk): if output dtype ever becomes bf16, reintroduce an f32 VMEM scratch
    # accumulator instead of accumulating into o_ref directly.
    return pl.pallas_call(
        _readout_kernel,
        out_shape=jax.ShapeDtypeStruct((N, M), x.dtype),
        grid_spec=pltpu.PrefetchScalarGridSpec(
            num_scalar_prefetch=0,
            grid=(n_m, n_k),
            in_specs=[
                pl.BlockSpec((N, tk), lambda m, k: (0, k)),    # x tile (K lane-dense)
                pl.BlockSpec((tm, tk), lambda m, k: (m, k)),   # weight tile, native layout
                pl.BlockSpec((1, tm), lambda m, k: (0, m)),    # bias row (resident)
            ],
            out_specs=pl.BlockSpec((N, tm), lambda m, k: (0, m)),
        ),
        compiler_params=pltpu.CompilerParams(
            # M tiles are independent (shards across TCs on v7x); K is a reduction.
            dimension_semantics=("parallel", "arbitrary"),
        ),
    )(x_flat, weight, b2d)


if __name__ == "__main__":
    # Small shapes consistent with the module: x is an NCHW feature map,
    # ReadOut flattens it and applies Linear(inp_size=C*H*W, out_size).
    N, C, H, W = 2, 4, 16, 16
    K = C * H * W            # 1024
    out_size = 32

    key = jax.random.PRNGKey(0)
    kx, kw, kb = jax.random.split(key, 3)

    x = jax.random.normal(kx, (N, C, H, W), dtype=jnp.float32)
    # Deterministic nn.Linear-style init (uniform in +-1/sqrt(K)).
    bound = 1.0 / (K ** 0.5)
    weight = jax.random.uniform(kw, (out_size, K), jnp.float32, -bound, bound)
    bias = jax.random.uniform(kb, (out_size,), jnp.float32, -bound, bound)

    y = readout_forward(x, weight, bias)
    y = jax.block_until_ready(y)

    # Reference check in plain JAX (same math as torch's Linear on flattened x).
    y_ref = x.reshape(N, -1) @ weight.T + bias
    assert y.shape == (N, out_size)
    assert jnp.allclose(y, y_ref, atol=1e-4, rtol=1e-4)

    print("KERNEL_OK")
</pallas_src>

<mosaic_0001>
module attributes {stable_mosaic.version = 11 : i64} {
  func.func @_readout_kernel(%arg0: i32, %arg1: i32, %arg2: memref<2x1024xf32, #tpu.memory_space<vmem>>, %arg3: memref<32x1024xf32, #tpu.memory_space<vmem>>, %arg4: memref<1x32xf32, #tpu.memory_space<vmem>>, %arg5: memref<2x32xf32, #tpu.memory_space<vmem>>) attributes {dimension_semantics = [#tpu.dimension_semantics<parallel>, #tpu.dimension_semantics<arbitrary>], iteration_bounds = array<i64: 1, 1>, scalar_prefetch = 0 : i64, scratch_operands = 0 : i64, tpu.core_type = #tpu.core_type<tc>, window_params = [{transform_indices = @transform_0, window_bounds = array<i64: 2, 1024>}, {transform_indices = @transform_1, window_bounds = array<i64: 32, 1024>}, {transform_indices = @transform_2, window_bounds = array<i64: 1, 32>}, {transform_indices = @transform_3, window_bounds = array<i64: 2, 32>}]} {
    %c0_i32 = arith.constant 0 : i32
    %0 = arith.cmpi eq, %arg1, %c0_i32 : i32
    %1 = arith.extui %0 : i1 to i32
    %c0_i32_0 = arith.constant 0 : i32
    %2 = arith.cmpi ne, %1, %c0_i32_0 : i32
    scf.if %2 {
      %c0_8 = arith.constant 0 : index
      %c0_9 = arith.constant 0 : index
      %9 = vector.load %arg4[%c0_8, %c0_9] : memref<1x32xf32, #tpu.memory_space<vmem>>, vector<1x32xf32>
      %10 = vector.shape_cast %9 : vector<1x32xf32> to vector<1x32xf32>
      %11 = vector.broadcast %10 : vector<1x32xf32> to vector<2x32xf32>
      %c0_10 = arith.constant 0 : index
      %c0_11 = arith.constant 0 : index
      %12 = vector.load %arg5[%c0_10, %c0_11] : memref<2x32xf32, #tpu.memory_space<vmem>>, vector<2x32xf32>
      tpu.vector_store %arg5[%c0_10, %c0_11], %11 {strides = array<i32>} : memref<2x32xf32, #tpu.memory_space<vmem>>, vector<2x32xf32>,
    } else {
    }
    %c0 = arith.constant 0 : index
    %c0_1 = arith.constant 0 : index
    %3 = vector.load %arg5[%c0, %c0_1] : memref<2x32xf32, #tpu.memory_space<vmem>>, vector<2x32xf32>
    %c0_2 = arith.constant 0 : index
    %c0_3 = arith.constant 0 : index
    %4 = vector.load %arg2[%c0_2, %c0_3] : memref<2x1024xf32, #tpu.memory_space<vmem>>, vector<2x1024xf32>
    %c0_4 = arith.constant 0 : index
    %c0_5 = arith.constant 0 : index
    %5 = vector.load %arg3[%c0_4, %c0_5] : memref<32x1024xf32, #tpu.memory_space<vmem>>, vector<32x1024xf32>
    %cst = arith.constant dense<0.000000e+00> : vector<2x32xf32>
    %6 = tpu.matmul %4, %5, %cst {dimension_numbers = #tpu.dot_dimension_numbers<[1], [1], [0], [0], [0, 0, 1, 0], [], []>} : vector<2x1024xf32>, vector<32x1024xf32>, vector<2x32xf32> -> vector<2x32xf32>
    %7 = arith.addf %3, %6 : vector<2x32xf32>
    %c0_6 = arith.constant 0 : index
    %c0_7 = arith.constant 0 : index
    %8 = vector.load %arg5[%c0_6, %c0_7] : memref<2x32xf32, #tpu.memory_space<vmem>>, vector<2x32xf32>
    tpu.vector_store %arg5[%c0_6, %c0_7], %7 {strides = array<i32>} : memref<2x32xf32, #tpu.memory_space<vmem>>, vector<2x32xf32>,
    return
  }
  func.func @transform_0(%arg0: i32, %arg1: i32) -> (i32, i32) {
    %c0_i32 = arith.constant 0 : i32
    %c0_i32_0 = arith.constant 0 : i32
    return %c0_i32, %arg1 : i32, i32
  }
  func.func @transform_1(%arg0: i32, %arg1: i32) -> (i32, i32) {
    %c0_i32 = arith.constant 0 : i32
    return %arg0, %arg1 : i32, i32
  }
  func.func @transform_2(%arg0: i32, %arg1: i32) -> (i32, i32) {
    %c0_i32 = arith.constant 0 : i32
    %c0_i32_0 = arith.constant 0 : i32
    return %c0_i32, %arg0 : i32, i32
  }
  func.func @transform_3(%arg0: i32, %arg1: i32) -> (i32, i32) {
    %c0_i32 = arith.constant 0 : i32
    %c0_i32_0 = arith.constant 0 : i32
    return %c0_i32, %arg0 : i32, i32
  }
}

</mosaic_0001>

<bundles_post_ra>
// kernel: tpu_custom_call.1
= control target key start
LH: loop header
LB: loop body
LE: loop exit
PB: predicated region body
PF: predicated region fallthrough
CT: control target
= control target key end

     0   :  { %8 = vsyncpa [#allocation3], 0  ;;  %s547_s0 = inlined_call_operand.hbm [shape: f32[2,1024], index: 0, kind: input, shape index: {}]   ;;  %s548_s1 = inlined_call_operand.hbm [shape: f32[32,1024], index: 1, kind: input, shape index: {}]   ;;  %s549_s2 = inlined_call_operand.vmem [shape: f32[1,32], index: 2, kind: input, shape index: {}]   ;;  %s550_s3 = inlined_call_operand.hbm [shape: f32[2,32], index: 3, kind: output, shape index: {}]  }
   0x1   :  { %9 = vsyncpa [#allocation6], 0 }
   0x2   :  { %10 = vsyncpa [#allocation4], 0  ;;  %s507_s12 = smov [#allocation2]   ;;  %s508_s14 = smov [#allocation5]  }
   0x3   :  { %s17_s13 = sshll.u32 %s507_s12, 4  ;;  %s26_s15 = sshll.u32 %s508_s14, 4  ;;  %s18_s13 = int_to_ptr.vmem [resolvable:$true] %s17_s13  ;;  %s27_s15 = int_to_ptr.vmem [resolvable:$true] %s26_s15 }
   0x4   :  { %s449_s16 = scalar_lea.vmem %s18_s13, 256  ;;  %p454_p1 = scmp.lt.s32.totalorder %s18_s13, %s18_s13 }
   0x5   :  { %p450_p0 = scmp.ne.s32.totalorder %s18_s13, %s449_s16  ;;  %p455_p2 = scmp.lt.s32.totalorder %s449_s16, %s449_s16 }
   0x7   :  { %p456_p3 = por %p455_p2, %p454_p1 }
   0x9   :  { %p457_p4 = pnand %p456_p3, %p450_p0 }
   0xb   :  { %460 = shalt.err (!%p457_p4)
}
   0xc   :  { %20 = dma.hbm_to_vmem [thread:$0]  %s547_s0, 256, %s18_s13, [#allocation3]  }
   0xd   :  { %s469_s19 = scalar_lea.vmem %s27_s15, 4096  ;;  %p474_p6 = scmp.lt.s32.totalorder %s27_s15, %s27_s15 }
   0xe   :  { %p470_p5 = scmp.ne.s32.totalorder %s27_s15, %s469_s19  ;;  %p475_p7 = scmp.lt.s32.totalorder %s469_s19, %s469_s19 }
  0x10   :  { %p476_p8 = por %p475_p7, %p474_p6 }
  0x12   :  { %p477_p9 = pnand %p476_p8, %p470_p5 }
  0x14   :  { %480 = shalt.err (!%p477_p9)
}
  0x15   :  { %s509_s20 = smov 1024   ;;  %s510_s21 = smov 64  }
  0x16   :  { %32 = dma.hbm_to_vmem [thread:$0]  %s548_s1, 4096, %s27_s15, [#allocation6], %s509_s20, %s509_s20, %s510_s21  }
  0x17   :  { %501 = dma.done.wait [#allocation3], 256  }
  0x18   :  { %502 = vsyncadd [#allocation3], 4294967040 }
  0x19   :  { %503 = dma.done.wait [#allocation6], 4096  }
  0x1a   :  { %504 = vsyncadd [#allocation6], 4294963200  ;;  %v511_v0 = vmov 1983009808   ;;  %v95_v2 = vlaneseq  ;;  %v82_v5 = vld [vmem:[#allocation5 + $0xc8] sm:$0xff]  ;;  %v84_v6 = vld [vmem:[#allocation5 + $0xd8] sm:$0xff] }
  0x1b   :  { %v93_v1 = vunpack.c.l.s4 %v511_v0  ;;  %v81_v7 = vld [vmem:[#allocation5 + $0xc0] sm:$0xff]  ;;  %157 = vmatprep.subr.mxu0 %v82_v5  ;;  %227 = vmatprep.subr.mxu1 %v84_v6  ;;  %v83_v8 = vld [vmem:[#allocation5 + $0xd0] sm:$0xff]  ;;  %v74_v9 = vld [vmem:[#allocation5 + $0x88] sm:$0xff]  ;;  %vm52_vm0 = vcmask 254976   ;;  %s512_s24 = smov [#allocation7]  }
  0x1c   :  { %v96_v4 = vshrl.u32 %v95_v2, 7  ;;  %v76_v10 = vld [vmem:[#allocation5 + $0x98] sm:$0xff]  ;;  %158 = vmatpush1.xpose.msra.mxu0 %v81_v7  ;;  %228 = vmatpush1.xpose.msra.mxu1 %v83_v8  ;;  %v73_v12 = vld [vmem:[#allocation5 + $0x80] sm:$0xff]  ;;  %v75_v13 = vld [vmem:[#allocation5 + $0x90] sm:$0xff]  ;;  %s422_s25 = sshll.u32 %s512_s24, 4  ;;  %s423_s25 = int_to_ptr.vmem [resolvable:$true] %s422_s25 }
  0x1d   :  { %v94_v3 = vunpack.c.0.s8 %v93_v1  ;;  %159 = vmatprep.subr.mxu0 %v74_v9  ;;  %229 = vmatprep.subr.mxu1 %v76_v10  ;;  %v66_v14 = vld [vmem:[#allocation5 + $0x48] sm:$0xff]  ;;  %v68_v15 = vld [vmem:[#allocation5 + $0x58] sm:$0xff]  ;;  %v55_v16 = vld [vmem:[#allocation2] sm:$0xff]  ;;  %p486_p11 = scmp.lt.s32.totalorder %s423_s25, %s423_s25 }
  0x1e   :  { %v91_v18 = vcombine.high %v55_v16, %v55_v16  ;;  %v65_v19 = vld [vmem:[#allocation5 + $0x40] sm:$0xff]  ;;  %v67_v20 = vld [vmem:[#allocation5 + $0x50] sm:$0xff]  ;;  %v58_v21 = vld [vmem:[#allocation5 + $0x8] sm:$0xff] }
  0x1f   :  { %v97_v11 = vsub.s32 %v94_v3, %v96_v4  ;;  %v60_v22 = vld [vmem:[#allocation5 + $0x18] sm:$0xff]  ;;  %v57_v26 = vld [vmem:[#allocation5] sm:$0xff]  ;;  %v59_v27 = vld [vmem:[#allocation5 + $0x10] sm:$0xff] }
  0x20   :  { %160 = vmatpush1.xpose.msra.mxu0 %v73_v12  ;;  %230 = vmatpush1.xpose.msra.mxu1 %v75_v13  ;;  %v56_v28 = vld [vmem:[#allocation2 + $0x8] sm:$0xff]  ;;  %v86_v29 = vld [vmem:[#allocation5 + $0xe8] sm:$0xff]  ;;  %v85_v34 = vld [vmem:[#allocation5 + $0xe0] sm:$0xff] }
  0x21   :  { %v98_v17 = vrot.slane %v55_v16, %v97_v11  ;;  %161 = vmatprep.subr.mxu0 %v66_v14  ;;  %231 = vmatprep.subr.mxu1 %v68_v15  ;;  %v105_v24 = vrot.slane %v91_v18, %v97_v11  ;;  %v88_v30 = vld [vmem:[#allocation5 + $0xf8] sm:$0xff]  ;;  %v115_v31 = vrot.slane %v56_v28, %v97_v11  ;;  %v87_v35 = vld [vmem:[#allocation5 + $0xf0] sm:$0xff]  ;;  %v78_v36 = vld [vmem:[#allocation5 + $0xa8] sm:$0xff] }
  0x22   :  { %v108_v32 = vcombine.high %v56_v28, %v56_v28  ;;  %v80_v37 = vld [vmem:[#allocation5 + $0xb8] sm:$0xff]  ;;  %v77_v40 = vld [vmem:[#allocation5 + $0xa0] sm:$0xff]  ;;  %v79_v41 = vld [vmem:[#allocation5 + $0xb0] sm:$0xff] }
  0x23   :  { %v106_v23 = vcombine.high %v98_v17, %v98_v17  ;;  %v107_v25 = vcombine.high %v105_v24, %v105_v24  ;;  %v123_v38 = vcombine.high %v115_v31, %v115_v31  ;;  %v70_v42 = vld [vmem:[#allocation5 + $0x68] sm:$0xff]  ;;  %v72_v43 = vld [vmem:[#allocation5 + $0x78] sm:$0xff]  ;;  %v69_v44 = vld [vmem:[#allocation5 + $0x60] sm:$0xff] }
  0x24   :  { %162 = vmatpush1.xpose.msra.mxu0 %v65_v19  ;;  %232 = vmatpush1.xpose.msra.mxu1 %v67_v20  ;;  %v122_v33 = vrot.slane %v108_v32, %v97_v11  ;;  %v71_v45 = vld [vmem:[#allocation5 + $0x70] sm:$0xff]  ;;  %v62_v46 = vld [vmem:[#allocation5 + $0x28] sm:$0xff]  ;;  %v64_v47 = vld [vmem:[#allocation5 + $0x38] sm:$0xff] }
  0x25   :  { %163 = vmatprep.subr.mxu0 %v58_v21  ;;  %233 = vmatprep.subr.mxu1 %v60_v22  ;;  %v61_v48 = vld [vmem:[#allocation5 + $0x20] sm:$0xff]  ;;  %v63_v49 = vld [vmem:[#allocation5 + $0x30] sm:$0xff] }
  0x26   :  { %197 = vmatprep.mubr.f32.mxu0 %v106_v23  ;;  %267 = vmatprep.mubr.f32.mxu1 %v107_v25  ;;  %v124_v39 = vcombine.high %v122_v33, %v122_v33  ;;  %v432_v50 = vld [vmem:[%s549_s2] ss:$0 sm:$0xff]  ;;  %s481_s2 = scalar_lea.vmem %s423_s25, 32 }
  0x27   :  { %53 = vst.msk [vmem:[#allocation7] sm:$0x3] %vm52_vm0, %v432_v50  ;;  %p482_p10 = scmp.ne.s32.totalorder %s423_s25, %s481_s2  ;;  %p487_p12 = scmp.lt.s32.totalorder %s481_s2, %s481_s2 }
  0x28   :  { %164 = vmatpush1.xpose.msra.mxu0 %v57_v26  ;;  %234 = vmatpush1.xpose.msra.mxu1 %v59_v27 }
  0x29   :  { %297 = vmatprep.subr.mxu0 %v86_v29  ;;  %367 = vmatprep.subr.mxu1 %v88_v30  ;;  %p488_p13 = por %p487_p12, %p486_p11 }
  0x2b   :  { %198 = vmatmul.mubr.f32.vlgmr.msra.gmra.mxu0 %v98_v17  ;;  %268 = vmatmul.mubr.f32.vlgmr.msra.gmra.mxu1 %v105_v24  ;;  %p489_p0 = pnand %p488_p13, %p482_p10 }
  0x2c   :  { %298 = vmatpush1.xpose.msra.mxu0 %v85_v34  ;;  %368 = vmatpush1.xpose.msra.mxu1 %v87_v35 }
  0x2d   :  { %299 = vmatprep.subr.mxu0 %v78_v36  ;;  %369 = vmatprep.subr.mxu1 %v80_v37 }
  0x2e   :  { %337 = vmatprep.mubr.f32.mxu0 %v123_v38  ;;  %407 = vmatprep.mubr.f32.mxu1 %v124_v39  ;;  %v54_v59 = vld [vmem:[#allocation7] sm:$0x3] }
  0x30   :  { %300 = vmatpush1.xpose.msra.mxu0 %v77_v40  ;;  %370 = vmatpush1.xpose.msra.mxu1 %v79_v41 }
  0x31   :  { %301 = vmatprep.subr.mxu0 %v70_v42  ;;  %371 = vmatprep.subr.mxu1 %v72_v43 }
  0x34   :  { %302 = vmatpush1.xpose.msra.mxu0 %v69_v44  ;;  %372 = vmatpush1.xpose.msra.mxu1 %v71_v45 }
  0x35   :  { %303 = vmatprep.subr.mxu0 %v62_v46  ;;  %373 = vmatprep.subr.mxu1 %v64_v47 }
  0x38   :  { %304 = vmatpush1.xpose.msra.mxu0 %v61_v48  ;;  %374 = vmatpush1.xpose.msra.mxu1 %v63_v49 }
  0x3b   :  { %338 = vmatmul.mubr.f32.vlgmr.msra.gmra.mxu0 %v115_v31  ;;  %408 = vmatmul.mubr.f32.vlgmr.msra.gmra.mxu1 %v122_v33 }
  0xeb   :  { %v199_v51 = vpop.f32.mrf.mxu0  ;;  %v269_v52 = vpop.f32.mrf.mxu1 }
  0xec   :  { %v270_v55 = vadd.f32 %v269_v52, %v199_v51 }
  0xed   :  { %v201_v53 = vpop.f32.mrf.mxu0  ;;  %v271_v54 = vpop.f32.mrf.mxu1 }
  0xfb   :  { %v339_v56 = vpop.f32.mrf.mxu0  ;;  %v409_v57 = vpop.f32.mrf.mxu1 }
  0xfc   :  { %v340_v58 = vadd.f32 %v339_v56, %v270_v55 }
  0xfd   :  { %v341_v60 = vpop.f32.mrf.mxu0  ;;  %v411_v61 = vpop.f32.mrf.mxu1 }
  0xfe   :  { %v410_v62 = vadd.f32 %v409_v57, %v340_v58 }
 0x100   :  { %v413_v63 = vadd.f32 %v410_v62, %v54_v59 }
 0x102   :  { %415 = vst.msk [vmem:[#allocation7] sm:$0x3] %vm52_vm0, %v413_v63 }
 0x103   :  { %492 = shalt.err (!%p489_p0)
}
 0x104   :  { %425 = dma.vmem_to_hbm [thread:$0]  %s423_s25, 32, %s550_s3, [#allocation4]  }
 0x105   :  { %505 = dma.done.wait [#allocation4], 32  }
 0x106   :  { %506 = vsyncadd [#allocation4], 4294967264 }
 0x107   :  { %429 = vsyncpa [#allocation3], 1 }
 0x108   :  { %430 = vsyncpa [#allocation6], 1 }
 0x109   :  { %431 = vsyncpa [#allocation4], 1 }

</bundles_post_ra>
